<compile_context>
chip_gen: v5e
topology: v5e:2x2
jax: 0.10.0
libtpu: 0.0.40
codegen_flags: <defaults>
</compile_context>

<pallas_src>
import functools

import jax
import jax.numpy as jnp
from jax.experimental import pallas as pl
from jax.experimental.pallas import tpu as pltpu


def _round_up(x: int, m: int) -> int:
    return ((x + m - 1) // m) * m


def _cdiv(a: int, b: int) -> int:
    return -(-a // b)


def _vmem_capacity_bytes() -> int:
    """Per-generation physical VMEM (v5e/v6e: 128 MiB, v7x: 64 MiB)."""
    try:
        return int(pltpu.get_tpu_info().vmem_capacity_bytes)
    except Exception:
        return 64 * 1024 * 1024  # conservative fallback (v7x per-core VMEM)


def _make_hinge_kernel(margin: float, eps: float, tb: int, tiles_per_split: int,
                       b_true: int, b_pad: int):
    """Per-split sum of hinge losses over batch-tiled embeddings."""

    def kernel(neg_ref, nn_ref, anchor_ref, out_ref, acc_ref):
        c = pl.program_id(0)   # TensorCore split (parallel)
        i = pl.program_id(1)   # batch-tile within split (reduction, "arbitrary")

        @pl.when(i == 0)
        def _init():
            acc_ref[...] = jnp.zeros_like(acc_ref)

        neg = neg_ref[...].astype(jnp.float32)     # triplet "anchor"   = embed_neg
        pos = nn_ref[...].astype(jnp.float32)      # triplet "positive" = embed_nn
        anc = anchor_ref[...].astype(jnp.float32)  # triplet "negative" = embed_anchor

        # p=2 pairwise distances (PyTorch adds eps to the difference before the norm).
        # Keep everything 2-D (tb, 1) to stay in native (sublane, lane) layout.
        d_ap = jnp.sqrt(jnp.sum((neg - pos + eps) ** 2, axis=-1, keepdims=True))  # (tb, 1)
        d_an = jnp.sqrt(jnp.sum((neg - anc + eps) ** 2, axis=-1, keepdims=True))  # (tb, 1)
        hinge = jnp.maximum(d_ap - d_an + margin, 0.0)                             # (tb, 1)

        if b_pad == b_true:
            # Static fast path: no padded rows anywhere, never mask.
            acc_ref[...] += jnp.sum(hinge, keepdims=True)
        else:
            tile_start = (c * tiles_per_split + i) * tb
            no_pad = tile_start + tb <= b_true

            @pl.when(no_pad)
            def _fast():
                acc_ref[...] += jnp.sum(hinge, keepdims=True)

            @pl.when(jnp.logical_not(no_pad))
            def _masked():
                # Zero-padded rows would each contribute `margin`; mask them out.
                row = jax.lax.broadcasted_iota(jnp.int32, hinge.shape, 0) + tile_start
                acc_ref[...] += jnp.sum(jnp.where(row < b_true, hinge, 0.0),
                                        keepdims=True)

        @pl.when(i == tiles_per_split - 1)
        def _finalize():
            out_ref[...] = acc_ref[...].reshape(1, 1, 1)

    return kernel


@functools.partial(jax.jit,
                   static_argnames=("alpha1", "alpha2", "margin", "tile_rows"))
def my_loss_two(embed_anchor, embed_neg, embed_nn, dis_two, *,
                alpha1: float, alpha2: float, margin: float,
                tile_rows: int | None = None):
    """JAX/Pallas equivalent of MyLoss_two.forward.

    `tile_rows` (optional, testing/tuning) caps the batch-tile row count.
    """
    eps = 1e-6

    # --- embeddings: (B, D), keep original dtype (upcast happens inside the kernel) ---
    embed_anchor = embed_anchor.reshape(embed_anchor.shape[0], -1)
    embed_neg = embed_neg.reshape(embed_neg.shape[0], -1)
    embed_nn = embed_nn.reshape(embed_nn.shape[0], -1)
    B, D = embed_neg.shape
    itemsize = max(embed_neg.dtype.itemsize, 1)

    # --- batch tile size from a per-generation VMEM budget ---------------------------
    # 3 embedding inputs x 2 pipeline buffers x tb rows x lane-padded D x itemsize.
    vmem_phys = _vmem_capacity_bytes()
    tile_budget = int(vmem_phys * 0.60)
    lane_d = max(_round_up(D, 128), 128)          # lanes pad to 128 in VMEM when D < 128
    per_row_bytes = 3 * 2 * lane_d * itemsize
    tb_max = tile_budget // per_row_bytes
    tb_max = int(max(8, min(tb_max, 16384)))      # VMEM-bounded; no small hard cap
    tb_max = (tb_max // 8) * 8
    if tile_rows is not None:
        tb_max = max(8, min(tb_max, (int(tile_rows) // 8) * 8))
    tb_max = min(tb_max, _round_up(B, 8))         # don't pad tiny batches

    # --- grid layout: (num_splits, tiles_per_split); leading axis -> TensorCores -----
    num_tiles = _cdiv(B, tb_max)
    num_splits = 2 if num_tiles >= 2 else 1       # v7x: 2 TCs; serial (harmless) on v5e/v6e
    tiles_per_split = _cdiv(num_tiles, num_splits)
    total_tiles = num_splits * tiles_per_split
    # Rebalance tile rows so batch padding stays < 8 rows per tile.
    tb = _round_up(_cdiv(B, total_tiles), 8)
    b_pad = total_tiles * tb

    def _pad_rows(x):
        if x.shape[0] == b_pad:
            return x
        return jnp.pad(x, ((0, b_pad - x.shape[0]), (0, 0)))

    neg_p = _pad_rows(embed_neg)
    nn_p = _pad_rows(embed_nn)
    anc_p = _pad_rows(embed_anchor)

    kernel = _make_hinge_kernel(float(margin), eps, tb, tiles_per_split, B, b_pad)

    emb_spec = pl.BlockSpec((tb, D), lambda c, i: (c * tiles_per_split + i, 0))

    # --- per-generation VMEM accounting + limit --------------------------------------
    actual_vmem = 3 * 2 * tb * lane_d * itemsize + 64 * 1024
    vmem_limit = int(min(vmem_phys * 0.9,
                         max(16 * 1024 * 1024, actual_vmem + 4 * 1024 * 1024)))

    cost = pl.CostEstimate(
        flops=10 * B * D,
        transcendentals=2 * B,
        bytes_accessed=3 * b_pad * D * itemsize + num_splits * 4,
    )

    # TODO(synk): for D < 128, pack k = 128 // D original rows per 128-lane vreg row in the
    # wrapper and compute the per-row sums as a (tb,128)x(128,k) MXU segment-sum to recover
    # the ~4x VMEM/VALU waste from lane padding.
    partial_sums = pl.pallas_call(
        kernel,
        out_shape=jax.ShapeDtypeStruct((num_splits, 1, 1), jnp.float32),
        grid_spec=pltpu.PrefetchScalarGridSpec(
            num_scalar_prefetch=0,
            grid=(num_splits, tiles_per_split),
            in_specs=[emb_spec, emb_spec, emb_spec],
            out_specs=pl.BlockSpec((1, 1, 1), lambda c, i: (c, 0, 0)),
            scratch_shapes=[pltpu.VMEM((1, 1), jnp.float32)],
        ),
        compiler_params=pltpu.CompilerParams(
            dimension_semantics=("parallel", "arbitrary"),
            vmem_limit_bytes=vmem_limit,
        ),
        cost_estimate=cost,
    )(neg_p, nn_p, anc_p)

    loss_tml = jnp.sum(partial_sums) / B
    # mean(disTwo) stays outside the kernel: a standalone jnp.mean runs at full HBM rate under
    # XLA and keeps the disTwo slab out of (v7x's 64 MiB) VMEM. Empty disTwo -> NaN, as torch.
    loss_dis = jnp.mean(dis_two.astype(jnp.float32))
    return alpha1 * loss_tml + alpha2 * loss_dis


def _ref_loss(embed_anchor, embed_neg, embed_nn, dis_two, alpha1, alpha2, margin,
              eps=1e-6):
    d_ap = jnp.sqrt(jnp.sum((embed_neg - embed_nn + eps) ** 2, axis=-1))
    d_an = jnp.sqrt(jnp.sum((embed_neg - embed_anchor + eps) ** 2, axis=-1))
    loss_tml = jnp.mean(jnp.maximum(d_ap - d_an + margin, 0.0))
    return alpha1 * loss_tml + alpha2 * jnp.mean(dis_two)


if __name__ == "__main__":
    alpha1, alpha2, margin = 1.0, 0.5, 0.2
    root_key = jax.random.PRNGKey(0)

    def run_case(B, D, tile_rows=None):
        k1, k2, k3, k4 = jax.random.split(jax.random.fold_in(root_key, B * 131 + D), 4)
        embed_anchor = jax.random.normal(k1, (B, D), dtype=jnp.float32)
        embed_neg = jax.random.normal(k2, (B, D), dtype=jnp.float32)
        embed_nn = jax.random.normal(k3, (B, D), dtype=jnp.float32)
        dis_two = jax.random.uniform(k4, (B,), dtype=jnp.float32)

        loss = my_loss_two(embed_anchor, embed_neg, embed_nn, dis_two,
                           alpha1=alpha1, alpha2=alpha2, margin=margin,
                           tile_rows=tile_rows)
        loss = jax.block_until_ready(loss)
        ref = _ref_loss(embed_anchor, embed_neg, embed_nn, dis_two,
                        alpha1, alpha2, margin)
        assert jnp.allclose(loss, ref, rtol=1e-5, atol=1e-5), (B, D, float(loss), float(ref))

    # B=6: non-multiple-of-8 batch -> masked boundary tile, single split.
    run_case(6, 32)
    # B=40 with forced 8-row tiles -> multi-tile, 2-way split, fully-padded tail tile.
    run_case(40, 32, tile_rows=8)
    # B=48 with forced 8-row tiles -> exact multiple: static no-mask fast path on both splits.
    run_case(48, 32, tile_rows=8)

    print("KERNEL_OK")
</pallas_src>

<mosaic_0001>
module attributes {stable_mosaic.version = 11 : i64} {
  func.func @kernel(%arg0: i32, %arg1: i32, %arg2: memref<8x32xf32, #tpu.memory_space<vmem>>, %arg3: memref<8x32xf32, #tpu.memory_space<vmem>>, %arg4: memref<8x32xf32, #tpu.memory_space<vmem>>, %arg5: memref<1x1x1xf32, #tpu.memory_space<vmem>>, %arg6: memref<1x1xf32, #tpu.memory_space<vmem>>) attributes {dimension_semantics = [#tpu.dimension_semantics<parallel>, #tpu.dimension_semantics<arbitrary>], iteration_bounds = array<i64: 1, 1>, scalar_prefetch = 0 : i64, scratch_operands = 1 : i64, tpu.core_type = #tpu.core_type<tc>, window_params = [{transform_indices = @transform_0, window_bounds = array<i64: 8, 32>}, {transform_indices = @transform_1, window_bounds = array<i64: 8, 32>}, {transform_indices = @transform_2, window_bounds = array<i64: 8, 32>}, {transform_indices = @transform_3, window_bounds = array<i64: 1, 1, 1>}]} {
    %c0_i32 = arith.constant 0 : i32
    %0 = arith.cmpi eq, %arg1, %c0_i32 : i32
    %1 = arith.extui %0 : i1 to i32
    %c0_i32_0 = arith.constant 0 : i32
    %2 = arith.cmpi ne, %1, %c0_i32_0 : i32
    scf.if %2 {
      %cst_16 = arith.constant 0.000000e+00 : f32
      %38 = vector.broadcast %cst_16 : f32 to vector<1x1xf32>
      %c0_17 = arith.constant 0 : index
      %c0_18 = arith.constant 0 : index
      %39 = vector.load %arg6[%c0_17, %c0_18] : memref<1x1xf32, #tpu.memory_space<vmem>>, vector<1x1xf32>
      tpu.vector_store %arg6[%c0_17, %c0_18], %38 {strides = array<i32>} : memref<1x1xf32, #tpu.memory_space<vmem>>, vector<1x1xf32>,
    } else {
    }
    %c0 = arith.constant 0 : index
    %c0_1 = arith.constant 0 : index
    %3 = vector.load %arg2[%c0, %c0_1] : memref<8x32xf32, #tpu.memory_space<vmem>>, vector<8x32xf32>
    %c0_2 = arith.constant 0 : index
    %c0_3 = arith.constant 0 : index
    %4 = vector.load %arg3[%c0_2, %c0_3] : memref<8x32xf32, #tpu.memory_space<vmem>>, vector<8x32xf32>
    %c0_4 = arith.constant 0 : index
    %c0_5 = arith.constant 0 : index
    %5 = vector.load %arg4[%c0_4, %c0_5] : memref<8x32xf32, #tpu.memory_space<vmem>>, vector<8x32xf32>
    %6 = arith.subf %3, %4 : vector<8x32xf32>
    %cst = arith.constant 9.99999997E-7 : f32
    %7 = vector.broadcast %cst : f32 to vector<8x32xf32>
    %8 = arith.addf %6, %7 : vector<8x32xf32>
    %9 = arith.mulf %8, %8 : vector<8x32xf32>
    %cst_6 = arith.constant dense<0.000000e+00> : vector<8xf32>
    %10 = vector.multi_reduction <add>, %9, %cst_6 [1] : vector<8x32xf32> to vector<8xf32>
    %11 = vector.shape_cast %10 : vector<8xf32> to vector<8x1xf32>
    %12 = math.sqrt %11 : vector<8x1xf32>
    %13 = arith.subf %3, %5 : vector<8x32xf32>
    %cst_7 = arith.constant 9.99999997E-7 : f32
    %14 = vector.broadcast %cst_7 : f32 to vector<8x32xf32>
    %15 = arith.addf %13, %14 : vector<8x32xf32>
    %16 = arith.mulf %15, %15 : vector<8x32xf32>
    %cst_8 = arith.constant dense<0.000000e+00> : vector<8xf32>
    %17 = vector.multi_reduction <add>, %16, %cst_8 [1] : vector<8x32xf32> to vector<8xf32>
    %18 = vector.shape_cast %17 : vector<8xf32> to vector<8x1xf32>
    %19 = math.sqrt %18 : vector<8x1xf32>
    %20 = arith.subf %12, %19 : vector<8x1xf32>
    %cst_9 = arith.constant 2.000000e-01 : f32
    %21 = vector.broadcast %cst_9 : f32 to vector<8x1xf32>
    %22 = arith.addf %20, %21 : vector<8x1xf32>
    %cst_10 = arith.constant 0.000000e+00 : f32
    %23 = vector.broadcast %cst_10 : f32 to vector<8x1xf32>
    %24 = arith.maximumf %22, %23 : vector<8x1xf32>
    %c1_i32 = arith.constant 1 : i32
    %25 = arith.muli %arg0, %c1_i32 : i32
    %26 = arith.addi %25, %arg1 : i32
    %c8_i32 = arith.constant 8 : i32
    %27 = arith.muli %26, %c8_i32 : i32
    %c8_i32_11 = arith.constant 8 : i32
    %28 = arith.addi %27, %c8_i32_11 : i32
    %c6_i32 = arith.constant 6 : i32
    %29 = arith.cmpi sle, %28, %c6_i32 : i32
    %30 = arith.extui %29 : i1 to i32
    %c0_i32_12 = arith.constant 0 : i32
    %31 = arith.cmpi ne, %30, %c0_i32_12 : i32
    scf.if %31 {
      %c0_16 = arith.constant 0 : index
      %c0_17 = arith.constant 0 : index
      %38 = vector.load %arg6[%c0_16, %c0_17] : memref<1x1xf32, #tpu.memory_space<vmem>>, vector<1x1xf32>
      %39 = vector.shape_cast %24 : vector<8x1xf32> to vector<1x8x1xf32>
      %cst_18 = arith.constant dense<0.000000e+00> : vector<1xf32>
      %40 = vector.multi_reduction <add>, %39, %cst_18 [1, 2] : vector<1x8x1xf32> to vector<1xf32>
      %41 = vector.shape_cast %40 : vector<1xf32> to vector<1x1x1xf32>
      %42 = vector.extract %41[0, 0, 0] : f32 from vector<1x1x1xf32>
      %43 = vector.broadcast %42 : f32 to vector<1x1xf32>
      %44 = arith.addf %38, %43 : vector<1x1xf32>
      %c0_19 = arith.constant 0 : index
      %c0_20 = arith.constant 0 : index
      %45 = vector.load %arg6[%c0_19, %c0_20] : memref<1x1xf32, #tpu.memory_space<vmem>>, vector<1x1xf32>
      tpu.vector_store %arg6[%c0_19, %c0_20], %44 {strides = array<i32>} : memref<1x1xf32, #tpu.memory_space<vmem>>, vector<1x1xf32>,
    } else {
    }
    %true = arith.constant true
    %32 = arith.xori %29, %true : i1
    %33 = arith.extui %32 : i1 to i32
    %c0_i32_13 = arith.constant 0 : i32
    %34 = arith.cmpi ne, %33, %c0_i32_13 : i32
    scf.if %34 {
      %38 = tpu.iota {dimensions = array<i32: 0>} : vector<8x1xi32>
      %39 = vector.broadcast %27 : i32 to vector<8x1xi32>
      %40 = arith.addi %38, %39 : vector<8x1xi32>
      %c0_16 = arith.constant 0 : index
      %c0_17 = arith.constant 0 : index
      %41 = vector.load %arg6[%c0_16, %c0_17] : memref<1x1xf32, #tpu.memory_space<vmem>>, vector<1x1xf32>
      %c6_i32_18 = arith.constant 6 : i32
      %42 = vector.broadcast %c6_i32_18 : i32 to vector<8x1xi32>
      %43 = arith.cmpi slt, %40, %42 : vector<8x1xi32>
      %cst_19 = arith.constant 0.000000e+00 : f32
      %44 = vector.broadcast %cst_19 : f32 to vector<8x1xf32>
      %45 = arith.select %43, %24, %44 : vector<8x1xi1>, vector<8x1xf32>
      %46 = vector.shape_cast %45 : vector<8x1xf32> to vector<1x8x1xf32>
      %cst_20 = arith.constant dense<0.000000e+00> : vector<1xf32>
      %47 = vector.multi_reduction <add>, %46, %cst_20 [1, 2] : vector<1x8x1xf32> to vector<1xf32>
      %48 = vector.shape_cast %47 : vector<1xf32> to vector<1x1x1xf32>
      %49 = vector.extract %48[0, 0, 0] : f32 from vector<1x1x1xf32>
      %50 = vector.broadcast %49 : f32 to vector<1x1xf32>
      %51 = arith.addf %41, %50 : vector<1x1xf32>
      %c0_21 = arith.constant 0 : index
      %c0_22 = arith.constant 0 : index
      %52 = vector.load %arg6[%c0_21, %c0_22] : memref<1x1xf32, #tpu.memory_space<vmem>>, vector<1x1xf32>
      tpu.vector_store %arg6[%c0_21, %c0_22], %51 {strides = array<i32>} : memref<1x1xf32, #tpu.memory_space<vmem>>, vector<1x1xf32>,
    } else {
    }
    %c0_i32_14 = arith.constant 0 : i32
    %35 = arith.cmpi eq, %arg1, %c0_i32_14 : i32
    %36 = arith.extui %35 : i1 to i32
    %c0_i32_15 = arith.constant 0 : i32
    %37 = arith.cmpi ne, %36, %c0_i32_15 : i32
    scf.if %37 {
      %c0_16 = arith.constant 0 : index
      %c0_17 = arith.constant 0 : index
      %38 = vector.load %arg6[%c0_16, %c0_17] : memref<1x1xf32, #tpu.memory_space<vmem>>, vector<1x1xf32>
      %39 = vector.shape_cast %38 : vector<1x1xf32> to vector<1x1x1xf32>
      %c0_18 = arith.constant 0 : index
      %c0_19 = arith.constant 0 : index
      %c0_20 = arith.constant 0 : index
      %40 = vector.load %arg5[%c0_18, %c0_19, %c0_20] : memref<1x1x1xf32, #tpu.memory_space<vmem>>, vector<1x1x1xf32>
      tpu.vector_store %arg5[%c0_18, %c0_19, %c0_20], %39 {strides = array<i32>} : memref<1x1x1xf32, #tpu.memory_space<vmem>>, vector<1x1x1xf32>,
    } else {
    }
    return
  }
  func.func @transform_0(%arg0: i32, %arg1: i32) -> (i32, i32) {
    %c1_i32 = arith.constant 1 : i32
    %0 = arith.muli %arg0, %c1_i32 : i32
    %1 = arith.addi %0, %arg1 : i32
    %c0_i32 = arith.constant 0 : i32
    %c0_i32_0 = arith.constant 0 : i32
    return %1, %c0_i32 : i32, i32
  }
  func.func @transform_1(%arg0: i32, %arg1: i32) -> (i32, i32) {
    %c1_i32 = arith.constant 1 : i32
    %0 = arith.muli %arg0, %c1_i32 : i32
    %1 = arith.addi %0, %arg1 : i32
    %c0_i32 = arith.constant 0 : i32
    %c0_i32_0 = arith.constant 0 : i32
    return %1, %c0_i32 : i32, i32
  }
  func.func @transform_2(%arg0: i32, %arg1: i32) -> (i32, i32) {
    %c1_i32 = arith.constant 1 : i32
    %0 = arith.muli %arg0, %c1_i32 : i32
    %1 = arith.addi %0, %arg1 : i32
    %c0_i32 = arith.constant 0 : i32
    %c0_i32_0 = arith.constant 0 : i32
    return %1, %c0_i32 : i32, i32
  }
  func.func @transform_3(%arg0: i32, %arg1: i32) -> (i32, i32, i32) {
    %c0_i32 = arith.constant 0 : i32
    %c0_i32_0 = arith.constant 0 : i32
    %c0_i32_1 = arith.constant 0 : i32
    return %arg0, %c0_i32, %c0_i32_0 : i32, i32, i32
  }
}

</mosaic_0001>

<bundles_post_ra>
// kernel: my_loss_two.1
= control target key start
LH: loop header
LB: loop body
LE: loop exit
PB: predicated region body
PF: predicated region fallthrough
CT: control target
= control target key end

     0   :  { %s275_s0 = inlined_call_operand.vmem [shape: f32[8,32], index: 0, kind: input, shape index: {}]   ;;  %s276_s1 = inlined_call_operand.vmem [shape: f32[8,32], index: 1, kind: input, shape index: {}]   ;;  %s277_s2 = inlined_call_operand.vmem [shape: f32[8,32], index: 2, kind: input, shape index: {}]   ;;  %s278_s3 = inlined_call_operand.hbm [shape: f32[1,1,1], index: 3, kind: output, shape index: {}]  }
   0x1   :  { %v72_v0 = vld [vmem:[%s275_s0] sm:$0xff] }
   0x2   :  { %v73_v1 = vld [vmem:[%s276_s1] sm:$0xff] }
   0x3   :  { %v74_v2 = vld [vmem:[%s277_s2] sm:$0xff]  ;;  %v75_v3 = vsub.f32 %v72_v0, %v73_v1 }
   0x4   :  { %v94_v4 = vsub.f32 %v72_v0, %v74_v2 }
   0x5   :  { %8 = vsyncpa [#allocation4], 0  ;;  %v76_v5 = vadd.f32 1e-06, %v75_v3  ;;  %vm78_vm0 = vcmask 261120   ;;  %v142_v26 = vlaneseq  ;;  %vm149_vm6 = vcmask 7168  }
   0x6   :  { %v95_v7 = vadd.f32 1e-06, %v94_v4  ;;  %vm70_vm7 = vcmask 0   ;;  %v238_v40 = vmov 0.0   ;;  %s239_s1 = smov [#allocation3]   ;;  %s177_s20 = sshll.u32 %s278_s3, 4  ;;  %s178_s20 = int_to_ptr.hbm [resolvable:$true] %s177_s20 }
   0x7   :  { %v77_v6 = vmul.f32 %v76_v5, %v76_v5  ;;  %v143_v34 = vshrl.u32 %v142_v26, 7  ;;  %71 = vst.msk [vmem:[#allocation2] sm:$0x1] %vm70_vm7, %v238_v40  ;;  %s175_s2 = sshll.u32 %s239_s1, 4  ;;  %s176_s2 = int_to_ptr.vmem [resolvable:$true] %s175_s2 }
   0x8   :  { %v96_v9 = vmul.f32 %v95_v7, %v95_v7 }
   0x9   :  { %v79_v8 = vsel %vm78_vm0, %v77_v6, 0.0  ;;  %vm147_vm5 = vcmp.lt.s32.totalorder %v143_v34, 6 }
   0xa   :  { %80 = vadd.xlane.f32.xlu0 %v79_v8  ;;  %v97_v10 = vsel %vm78_vm0, %v96_v9, 0.0 }
   0xe   :  { %v146_v48 = vld [vmem:[#allocation2] sm:$0x1] }
  0x12   :  { %98 = vadd.xlane.f32.xlu0 %v97_v10 }
  0x7d   :  { %v81_v11 = vpop.xlane.xlu0 %80 }
  0x7e   :  { %208 = vrsqrt.f32 %v81_v11  ;;  %vm89_vm1 = vcmp.eq.f32.partialorder %v81_v11, inf  ;;  %v92_v29 = vand.u32 2147483648, %v81_v11  ;;  %vm91_vm3 = vcmp.eq.f32.partialorder %v81_v11, 0.0 }
  0x84   :  { %v209_v12 = vpop.eup %208 }
  0x85   :  { %v83_v13 = vmul.f32 %v209_v12, %v81_v11  ;;  %v99_v14 = vpop.xlane.xlu0 %98 }
  0x86   :  { %210 = vrsqrt.f32 %v99_v14  ;;  %vm107_vm2 = vcmp.eq.f32.partialorder %v99_v14, inf  ;;  %v110_v30 = vand.u32 2147483648, %v99_v14  ;;  %vm109_vm4 = vcmp.eq.f32.partialorder %v99_v14, 0.0 }
  0x87   :  { %v84_v15 = vmul.f32 %v209_v12, %v83_v13 }
  0x89   :  { %v85_v16 = vmul.f32 0.5, %v84_v15 }
  0x8b   :  { %v86_v17 = vsub.f32 1.5, %v85_v16 }
  0x8c   :  { %v211_v18 = vpop.eup %210 }
  0x8d   :  { %v101_v19 = vmul.f32 %v211_v18, %v99_v14  ;;  %v87_v21 = vmul.f32 %v209_v12, %v86_v17 }
  0x8f   :  { %v102_v20 = vmul.f32 %v211_v18, %v101_v19  ;;  %v88_v24 = vmul.f32 %v87_v21, %v81_v11 }
  0x91   :  { %v103_v22 = vmul.f32 0.5, %v102_v20  ;;  %v90_v27 = vsel %vm89_vm1, %v81_v11, %v88_v24 }
  0x92   :  { %v93_v32 = vsel %vm91_vm3, %v92_v29, %v90_v27 }
  0x93   :  { %v104_v23 = vsub.f32 1.5, %v103_v22 }
  0x95   :  { %v105_v25 = vmul.f32 %v211_v18, %v104_v23 }
  0x97   :  { %v106_v28 = vmul.f32 %v105_v25, %v99_v14 }
  0x99   :  { %v108_v31 = vsel %vm107_vm2, %v99_v14, %v106_v28 }
  0x9a   :  { %v111_v33 = vsel %vm109_vm4, %v110_v30, %v108_v31 }
  0x9b   :  { %v112_v35 = vsub.f32 %v93_v32, %v111_v33 }
  0x9d   :  { %v113_v36 = vadd.f32 0.2, %v112_v35 }
  0x9f   :  { %v114_v37 = vmax.f32 %v113_v36, 0.0 }
  0xa1   :  { %v148_v38 = vsel %vm147_vm5, %v114_v37, 0.0 }
  0xa2   :  { %v150_v39 = vsel %vm149_vm6, %v148_v38, 0.0 }
  0xa3   :  { %151 = vadd.xlane.f32.xlu1 %v150_v39 }
 0x116   :  { %v152_v41 = vpop.xlane.xlu1 %151 }
 0x117   :  { %v153_v42 = vrot.slane %v152_v41, 4 }
 0x119   :  { %v154_v43 = vadd.f32 %v153_v42, %v152_v41 }
 0x11b   :  { %v155_v44 = vrot.slane %v154_v43, 2 }
 0x11d   :  { %v156_v45 = vadd.f32 %v155_v44, %v154_v43 }
 0x11f   :  { %v157_v46 = vrot.slane %v156_v45, 1 }
 0x121   :  { %v158_v47 = vadd.f32 %v157_v46, %v156_v45 }
 0x123   :  { %204 = vpush %v158_v47 }
 0x154   :  { %s205_s0 = spop %204 }
 0x155   :  { %v160_v49 = vstv %s205_s0 }
 0x156   :  { %v161_v50 = vadd.f32 %v160_v49, %v146_v48 }
 0x158   :  { %163 = vst.msk [vmem:[#allocation2] sm:$0x1] %vm70_vm7, %v161_v50 }
 0x15f   :  { %v167_v51 = vld [vmem:[#allocation2] sm:$0x1] }
 0x160   :  { %169 = vst.msk [vmem:[#allocation3] sm:$0x1] %vm70_vm7, %v167_v51 }
 0x161   :  { %180 = dma.vmem_to_hbm [thread:$0]  %s176_s2, 16, %s178_s20, [#allocation4]  }
 0x162   :  { %236 = dma.done.wait [#allocation4], 16  }
 0x163   :  { %237 = vsyncadd [#allocation4], 4294967280 }
 0x164   :  { %185 = vsyncpa [#allocation4], 1 }

</bundles_post_ra>
